<compile_context>
chip_gen: v6e
topology: v6e:2x2x1
jax: 0.10.0
libtpu: 0.0.40
codegen_flags: <defaults>
</compile_context>

<pallas_src>
import functools

import jax
import jax.numpy as jnp
from jax.experimental import pallas as pl
from jax.experimental.pallas import tpu as pltpu


# ---------------------------------------------------------------------------
# Tile-size helper: largest aligned tile <= preferred that divides the dim,
# otherwise the full dim (always satisfies the (8,128) BlockSpec rule).
# ---------------------------------------------------------------------------
def _pick_tile(dim, preferred, align):
    if dim <= preferred:
        return dim
    t = (preferred // align) * align
    while t >= align:
        if dim % t == 0:
            return t
        t -= align
    return dim


# ---------------------------------------------------------------------------
# Kernels 1 & 3: tiled dense projection  y = x @ w (+ bias)
# ---------------------------------------------------------------------------
def _matmul_kernel(x_ref, w_ref, o_ref, acc_ref):
    @pl.when(pl.program_id(2) == 0)
    def _init():
        acc_ref[...] = jnp.zeros_like(acc_ref)

    acc_ref[...] += jnp.dot(x_ref[...], w_ref[...],
                            preferred_element_type=jnp.float32)

    @pl.when(pl.program_id(2) == pl.num_programs(2) - 1)
    def _done():
        o_ref[...] = acc_ref[...].astype(o_ref.dtype)


def _matmul_bias_kernel(x_ref, w_ref, b_ref, o_ref, acc_ref):
    @pl.when(pl.program_id(2) == 0)
    def _init():
        acc_ref[...] = jnp.zeros_like(acc_ref)

    acc_ref[...] += jnp.dot(x_ref[...], w_ref[...],
                            preferred_element_type=jnp.float32)

    @pl.when(pl.program_id(2) == pl.num_programs(2) - 1)
    def _done():
        o_ref[...] = (acc_ref[...] + b_ref[...]).astype(o_ref.dtype)


def linear(x2d, w, b=None, *, out_dtype=None,
           tm_pref=256, tn_pref=256, tk_pref=512):
    """x2d: (M, K), w: (K, N), optional b: (1, N) -> (M, N)."""
    M, K = x2d.shape
    K2, N = w.shape
    assert K == K2
    out_dtype = out_dtype or x2d.dtype

    tm = _pick_tile(M, tm_pref, 8)
    tn = _pick_tile(N, tn_pref, 128)
    tk = _pick_tile(K, tk_pref, 128)
    grid = (M // tm, N // tn, K // tk)

    in_specs = [
        pl.BlockSpec((tm, tk), lambda i, j, k: (i, k)),
        pl.BlockSpec((tk, tn), lambda i, j, k: (k, j)),
    ]
    args = [x2d, w]
    kernel = _matmul_kernel
    if b is not None:
        in_specs.append(pl.BlockSpec((1, tn), lambda i, j, k: (0, j)))
        args.append(b)
        kernel = _matmul_bias_kernel

    return pl.pallas_call(
        kernel,
        out_shape=jax.ShapeDtypeStruct((M, N), out_dtype),
        grid_spec=pltpu.PrefetchScalarGridSpec(
            num_scalar_prefetch=0,
            grid=grid,
            in_specs=in_specs,
            out_specs=pl.BlockSpec((tm, tn), lambda i, j, k: (i, j)),
            scratch_shapes=[pltpu.VMEM((tm, tn), jnp.float32)],
        ),
        compiler_params=pltpu.CompilerParams(
            dimension_semantics=("parallel", "parallel", "arbitrary")),
    )(*args)


# ---------------------------------------------------------------------------
# Kernel 2: flash-style attention, all heads of one batch element per step
# ---------------------------------------------------------------------------
def _flash_attn_kernel(q_ref, k_ref, v_ref, o_ref, m_sc, l_sc, acc_sc, *, scale):
    ki = pl.program_id(2)

    @pl.when(ki == 0)
    def _init():
        m_sc[...] = jnp.full_like(m_sc, -jnp.inf)
        l_sc[...] = jnp.zeros_like(l_sc)
        acc_sc[...] = jnp.zeros_like(acc_sc)

    q = q_ref[0]            # (H, tq, Dh)  bf16
    k = k_ref[0]            # (H, tk, Dh)  bf16
    v = v_ref[0]            # (H, tk, Dh)  bf16

    # scores: (H, tq, tk) — contract last dims (no explicit transpose of k)
    s = jnp.einsum("hqd,hkd->hqk", q, k,
                   preferred_element_type=jnp.float32) * scale

    m_prev = m_sc[...]                                      # (H, tq, 1)
    m_new = jnp.maximum(m_prev, jnp.max(s, axis=-1, keepdims=True))
    alpha = jnp.exp(m_prev - m_new)
    p = jnp.exp(s - m_new)                                  # (H, tq, tk) f32

    l_sc[...] = alpha * l_sc[...] + jnp.sum(p, axis=-1, keepdims=True)
    pv = jnp.einsum("hqk,hkd->hqd", p.astype(v.dtype), v,
                    preferred_element_type=jnp.float32)     # (H, tq, Dh)
    acc_sc[...] = alpha * acc_sc[...] + pv
    m_sc[...] = m_new

    @pl.when(ki == pl.num_programs(2) - 1)
    def _done():
        inv = pl.reciprocal(l_sc[...], approx=True)
        o_ref[0] = (acc_sc[...] * inv).astype(o_ref.dtype)


def attention_core(q, k, v, scale, *, tq_pref=256, tk_pref=256):
    """q, k, v: (B, H, N, Dh) -> (B, H, N, Dh)."""
    B, H, N, Dh = q.shape
    tq = _pick_tile(N, tq_pref, 128)
    tk = _pick_tile(N, tk_pref, 128)
    grid = (B, N // tq, N // tk)

    q_spec = pl.BlockSpec((1, H, tq, Dh), lambda b, qi, ki: (b, 0, qi, 0))
    kv_spec = pl.BlockSpec((1, H, tk, Dh), lambda b, qi, ki: (b, 0, ki, 0))
    o_spec = pl.BlockSpec((1, H, tq, Dh), lambda b, qi, ki: (b, 0, qi, 0))

    kern = functools.partial(_flash_attn_kernel, scale=scale)
    return pl.pallas_call(
        kern,
        out_shape=jax.ShapeDtypeStruct((B, H, N, Dh), q.dtype),
        grid_spec=pltpu.PrefetchScalarGridSpec(
            num_scalar_prefetch=0,
            grid=grid,
            in_specs=[q_spec, kv_spec, kv_spec],
            out_specs=o_spec,
            scratch_shapes=[
                pltpu.VMEM((H, tq, 1), jnp.float32),   # running max m
                pltpu.VMEM((H, tq, 1), jnp.float32),   # running sum l
                pltpu.VMEM((H, tq, Dh), jnp.float32),  # output accumulator
            ],
        ),
        compiler_params=pltpu.CompilerParams(
            dimension_semantics=("parallel", "parallel", "arbitrary")),
    )(q, k, v)


# ---------------------------------------------------------------------------
# Full module forward
# ---------------------------------------------------------------------------
def attention_forward(x, params, heads, dim_head):
    """x: (B, N, D). Mirrors Attention.forward (dropout=0 / eval mode)."""
    B, N, D = x.shape
    inner = heads * dim_head
    scale = dim_head ** (-0.5)
    mxu_dtype = jnp.bfloat16

    w_qkv = params["w_qkv"].astype(mxu_dtype)
    w_out = params["w_out"].astype(mxu_dtype)
    b_out = params["b_out"].astype(jnp.float32)

    # --- to_qkv (no bias): tiled matmul, bf16 operands, bf16 output ---
    x2d = x.reshape(B * N, D).astype(mxu_dtype)
    qkv = linear(x2d, w_qkv, out_dtype=mxu_dtype)              # (B*N, 3*inner)

    # split + 'b n (h d) -> b h n d' as one fused XLA transpose
    qkv = qkv.reshape(B, N, 3, heads, dim_head)
    qkv = jnp.transpose(qkv, (2, 0, 3, 1, 4))                  # (3, B, H, N, Dh)
    q, k, v = qkv[0], qkv[1], qkv[2]

    # --- flash attention (all heads per batch element per grid step) ---
    out = attention_core(q, k, v, scale)                       # (B, H, N, Dh) bf16

    # 'b h n d -> b n (h d)'
    out = jnp.transpose(out, (0, 2, 1, 3)).reshape(B * N, inner)

    # --- to_out: Linear(inner, D) + bias; Dropout(0.0) is identity ---
    y = linear(out, w_out, b_out, out_dtype=x.dtype)           # (B*N, D) f32
    return y.reshape(B, N, D)


# ---------------------------------------------------------------------------
# Pure-JAX reference (same bf16-operand / f32-accumulate policy as the kernels)
# ---------------------------------------------------------------------------
def attention_reference(x, params, heads, dim_head, mxu_dtype=jnp.bfloat16):
    B, N, D = x.shape
    inner = heads * dim_head
    scale = dim_head ** (-0.5)
    f32 = jnp.float32

    x2d = x.reshape(B * N, D).astype(mxu_dtype)
    qkv = jnp.dot(x2d, params["w_qkv"].astype(mxu_dtype),
                  preferred_element_type=f32).astype(mxu_dtype)
    qkv = qkv.reshape(B, N, 3, heads, dim_head)
    qkv = jnp.transpose(qkv, (2, 0, 3, 1, 4))
    q, k, v = qkv[0], qkv[1], qkv[2]                           # (B, H, N, Dh)

    dots = jnp.einsum("bhid,bhjd->bhij", q, k,
                      preferred_element_type=f32) * scale
    attn = jax.nn.softmax(dots, axis=-1)
    out = jnp.einsum("bhij,bhjd->bhid", attn.astype(mxu_dtype), v,
                     preferred_element_type=f32).astype(mxu_dtype)
    out = jnp.transpose(out, (0, 2, 1, 3)).reshape(B * N, inner)
    y = jnp.dot(out, params["w_out"].astype(mxu_dtype),
                preferred_element_type=f32) + params["b_out"]
    return y.reshape(B, N, D).astype(x.dtype)


if __name__ == "__main__":
    # Small shapes consistent with the module: dim=32, heads=4, dim_head=16.
    B, N, D = 2, 8, 32
    heads, dim_head = 4, 16
    inner = heads * dim_head

    key = jax.random.PRNGKey(0)
    kx, kq, ko, kb = jax.random.split(key, 4)
    x = jax.random.normal(kx, (B, N, D), dtype=jnp.float32)

    # Deterministic parameter init (to_qkv: no bias, to_out: with bias).
    params = {
        "w_qkv": jax.random.normal(kq, (D, inner * 3), dtype=jnp.float32) * (D ** -0.5),
        "w_out": jax.random.normal(ko, (inner, D), dtype=jnp.float32) * (inner ** -0.5),
        "b_out": jax.random.normal(kb, (1, D), dtype=jnp.float32) * 0.02,
    }

    y = attention_forward(x, params, heads, dim_head)
    y = jax.block_until_ready(y)

    y_ref = attention_reference(x, params, heads, dim_head)
    assert y.shape == (B, N, D)
    assert jnp.allclose(y, y_ref, atol=2e-2, rtol=2e-2), "mismatch vs reference"

    print("KERNEL_OK")
</pallas_src>

<mosaic_0001>
module attributes {stable_mosaic.version = 11 : i64} {
  func.func @_matmul_kernel(%arg0: i32, %arg1: i32, %arg2: i32, %arg3: memref<16x32xbf16, #tpu.memory_space<vmem>>, %arg4: memref<32x192xbf16, #tpu.memory_space<vmem>>, %arg5: memref<16x192xbf16, #tpu.memory_space<vmem>>, %arg6: memref<16x192xf32, #tpu.memory_space<vmem>>) attributes {dimension_semantics = [#tpu.dimension_semantics<parallel>, #tpu.dimension_semantics<parallel>, #tpu.dimension_semantics<arbitrary>], iteration_bounds = array<i64: 1, 1, 1>, scalar_prefetch = 0 : i64, scratch_operands = 1 : i64, tpu.core_type = #tpu.core_type<tc>, window_params = [{transform_indices = @transform_0, window_bounds = array<i64: 16, 32>}, {transform_indices = @transform_1, window_bounds = array<i64: 32, 192>}, {transform_indices = @transform_2, window_bounds = array<i64: 16, 192>}]} {
    %c0_i32 = arith.constant 0 : i32
    %0 = arith.cmpi eq, %arg2, %c0_i32 : i32
    %1 = arith.extui %0 : i1 to i32
    %c0_i32_0 = arith.constant 0 : i32
    %2 = arith.cmpi ne, %1, %c0_i32_0 : i32
    scf.if %2 {
      %cst_10 = arith.constant 0.000000e+00 : f32
      %12 = vector.broadcast %cst_10 : f32 to vector<16x192xf32>
      %c0_11 = arith.constant 0 : index
      %c0_12 = arith.constant 0 : index
      %13 = vector.load %arg6[%c0_11, %c0_12] : memref<16x192xf32, #tpu.memory_space<vmem>>, vector<16x192xf32>
      tpu.vector_store %arg6[%c0_11, %c0_12], %12 {strides = array<i32>} : memref<16x192xf32, #tpu.memory_space<vmem>>, vector<16x192xf32>,
    } else {
    }
    %c0 = arith.constant 0 : index
    %c0_1 = arith.constant 0 : index
    %3 = vector.load %arg6[%c0, %c0_1] : memref<16x192xf32, #tpu.memory_space<vmem>>, vector<16x192xf32>
    %c0_2 = arith.constant 0 : index
    %c0_3 = arith.constant 0 : index
    %4 = vector.load %arg3[%c0_2, %c0_3] : memref<16x32xbf16, #tpu.memory_space<vmem>>, vector<16x32xbf16>
    %c0_4 = arith.constant 0 : index
    %c0_5 = arith.constant 0 : index
    %5 = vector.load %arg4[%c0_4, %c0_5] : memref<32x192xbf16, #tpu.memory_space<vmem>>, vector<32x192xbf16>
    %cst = arith.constant dense<0.000000e+00> : vector<16x192xf32>
    %6 = tpu.matmul %4, %5, %cst {dimension_numbers = #tpu.dot_dimension_numbers<[1], [0], [0], [1], [0, 0, 1, 1], [], []>} : vector<16x32xbf16>, vector<32x192xbf16>, vector<16x192xf32> -> vector<16x192xf32>
    %7 = arith.addf %3, %6 : vector<16x192xf32>
    %c0_6 = arith.constant 0 : index
    %c0_7 = arith.constant 0 : index
    %8 = vector.load %arg6[%c0_6, %c0_7] : memref<16x192xf32, #tpu.memory_space<vmem>>, vector<16x192xf32>
    tpu.vector_store %arg6[%c0_6, %c0_7], %7 {strides = array<i32>} : memref<16x192xf32, #tpu.memory_space<vmem>>, vector<16x192xf32>,
    %c0_i32_8 = arith.constant 0 : i32
    %9 = arith.cmpi eq, %arg2, %c0_i32_8 : i32
    %10 = arith.extui %9 : i1 to i32
    %c0_i32_9 = arith.constant 0 : i32
    %11 = arith.cmpi ne, %10, %c0_i32_9 : i32
    scf.if %11 {
      %c0_10 = arith.constant 0 : index
      %c0_11 = arith.constant 0 : index
      %12 = vector.load %arg6[%c0_10, %c0_11] : memref<16x192xf32, #tpu.memory_space<vmem>>, vector<16x192xf32>
      %13 = arith.truncf %12 : vector<16x192xf32> to vector<16x192xbf16>
      %c0_12 = arith.constant 0 : index
      %c0_13 = arith.constant 0 : index
      %14 = vector.load %arg5[%c0_12, %c0_13] : memref<16x192xbf16, #tpu.memory_space<vmem>>, vector<16x192xbf16>
      tpu.vector_store %arg5[%c0_12, %c0_13], %13 {strides = array<i32>} : memref<16x192xbf16, #tpu.memory_space<vmem>>, vector<16x192xbf16>,
    } else {
    }
    return
  }
  func.func @transform_0(%arg0: i32, %arg1: i32, %arg2: i32) -> (i32, i32) {
    %c0_i32 = arith.constant 0 : i32
    return %arg0, %arg2 : i32, i32
  }
  func.func @transform_1(%arg0: i32, %arg1: i32, %arg2: i32) -> (i32, i32) {
    %c0_i32 = arith.constant 0 : i32
    return %arg2, %arg1 : i32, i32
  }
  func.func @transform_2(%arg0: i32, %arg1: i32, %arg2: i32) -> (i32, i32) {
    %c0_i32 = arith.constant 0 : i32
    return %arg0, %arg1 : i32, i32
  }
}

</mosaic_0001>

<bundles_post_ra>
// kernel: tpu_custom_call.1
= control target key start
LH: loop header
LB: loop body
LE: loop exit
PB: predicated region body
PF: predicated region fallthrough
CT: control target
= control target key end

     0   :  { %7 = vsyncpa [#allocation4], 0  ;;  %s314_s0 = inlined_call_operand.hbm [shape: bf16[16,32], index: 0, kind: input, shape index: {}]   ;;  %s315_s1 = inlined_call_operand.hbm [shape: bf16[32,192], index: 1, kind: input, shape index: {}]   ;;  %s316_s2 = inlined_call_operand.hbm [shape: bf16[16,192], index: 2, kind: output, shape index: {}]  }
   0x1   :  { %8 = vsyncpa [#allocation7], 0 }
   0x2   :  { %9 = vsyncpa [#allocation5], 0  ;;  %s275_s9 = smov [#allocation3]  }
   0x3   :  { %s15_s10 = sshll.u32 %s275_s9, 4  ;;  %s16_s10 = int_to_ptr.vmem [resolvable:$true] %s15_s10 }
   0x4   :  { %s217_s11 = scalar_lea.vmem %s16_s10, 128  ;;  %p222_p1 = scmp.lt.s32.totalorder %s16_s10, %s16_s10 }
   0x5   :  { %p218_p0 = scmp.ne.s32.totalorder %s16_s10, %s217_s11  ;;  %p223_p2 = scmp.lt.s32.totalorder %s217_s11, %s217_s11 }
   0x7   :  { %p224_p3 = por %p223_p2, %p222_p1 }
   0x9   :  { %p225_p4 = pnand %p224_p3, %p218_p0 }
   0xb   :  { %228 = shalt.err (!%p225_p4)
}
   0xc   :  { %s276_s12 = smov 64   ;;  %s277_s13 = smov 4  }
   0xd   :  { %21 = dma.hbm_to_vmem [thread:$0]  %s314_s0, 128, %s16_s10, [#allocation4], %s276_s12, %s276_s12, %s277_s13  }
   0xe   :  { %s278_s16 = smov [#allocation6]  }
   0xf   :  { %s27_s17 = sshll.u32 %s278_s16, 4  ;;  %s28_s17 = int_to_ptr.vmem [resolvable:$true] %s27_s17 }
  0x10   :  { %s237_s18 = scalar_lea.vmem %s28_s17, 512  ;;  %p242_p6 = scmp.lt.s32.totalorder %s28_s17, %s28_s17 }
  0x11   :  { %p238_p5 = scmp.ne.s32.totalorder %s28_s17, %s237_s18  ;;  %p243_p7 = scmp.lt.s32.totalorder %s237_s18, %s237_s18 }
  0x13   :  { %p244_p8 = por %p243_p7, %p242_p6 }
  0x15   :  { %p245_p9 = pnand %p244_p8, %p238_p5 }
  0x17   :  { %248 = shalt.err (!%p245_p9)
}
  0x18   :  { %s279_s19 = smov 128   ;;  %s280_s20 = smov 8  }
  0x19   :  { %33 = dma.hbm_to_vmem [thread:$0]  %s315_s1, 512, %s28_s17, [#allocation7], %s279_s19, %s279_s19, %s280_s20  }
  0x1a   :  { %269 = dma.done.wait [#allocation4], 128  }
  0x1b   :  { %270 = vsyncadd [#allocation4], 4294967168 }
  0x1c   :  { %271 = dma.done.wait [#allocation7], 512  }
  0x1d   :  { %272 = vsyncadd [#allocation7], 4294966784  ;;  %v281_v0 = vmov 0   ;;  %v202_v1 = vld [vmem:[#allocation6 + $0x14] ss:$8 sps:$4 sm:$0xff]   ;;  %vm85_vm0 = vcmask 261120  }
  0x1e   :  { %121 = vmatprep.mubr.bf16.mxu0 %v281_v0  ;;  %v204_v2 = vld [vmem:[#allocation6 + $0x10] ss:$8 sps:$4 sm:$0xff]   ;;  %101 = vmatprep.subr.bf16.mxu0 %v202_v1  ;;  %v205_v3 = vld [vmem:[#allocation6 + $0x4] ss:$8 sps:$4 sm:$0xff]   ;;  %v207_v4 = vld [vmem:[#allocation6] ss:$8 sps:$4 sm:$0xff]  }
  0x1f   :  { %102 = vmatpush1.bf16.msra.mxu0 %v204_v2  ;;  %v208_v5 = vld [vmem:[#allocation3] sm:$0xff]   ;;  %vm46_vm1 = vcmask 523264   ;;  %v282_v6 = vmov 0.0   ;;  %vm160_vm2 = vcmask 1043456   ;;  %vm161_vm3 = vcmask 523268   ;;  %s283_s0 = smov [#allocation8]  }
  0x20   :  { %103 = vmatprep.subr.bf16.mxu0 %v205_v3  ;;  %47 = vst.msk [vmem:[#allocation2 + $0x8] sm:$0xff] %vm46_vm1, %v282_v6  ;;  %49 = vst.msk [vmem:[#allocation2 + $0x18] sm:$0xff] %vm46_vm1, %v282_v6  ;;  %s170_s1 = sshll.u32 %s283_s0, 4  ;;  %s171_s1 = int_to_ptr.vmem [resolvable:$true] %s170_s1 }
  0x21   :  { %vm162_vm4 = vmor %vm161_vm3, %vm160_vm2  ;;  %s249_s23 = scalar_lea.vmem %s171_s1, 256  ;;  %p254_p11 = scmp.lt.s32.totalorder %s171_s1, %s171_s1 }
  0x22   :  { %p250_p10 = scmp.ne.s32.totalorder %s171_s1, %s249_s23  ;;  %p255_p12 = scmp.lt.s32.totalorder %s249_s23, %s249_s23 }
  0x23   :  { %104 = vmatpush1.bf16.msra.mxu0 %v207_v4 }
  0x24   :  { %p256_p13 = por %p255_p12, %p254_p11 }
  0x26   :  { %188 = vmatmul.mubr.msk.bf16.vlgmr.msra.gmra.mxu0 %vm85_vm0, %v208_v5  ;;  %p257_p0 = pnand %p256_p13, %p250_p10 }
  0x27   :  { %v51_v8 = vld [vmem:[#allocation2 + $0x8] sm:$0xff]  ;;  %v53_v12 = vld [vmem:[#allocation2 + $0x18] sm:$0xff] }
  0xe6   :  { %v123_v7 = vpop.f32.mrf.mxu0 }
  0xe8   :  { %v125_v9 = vpop.f32.mrf.mxu0 }
  0xe9   :  { %v133_v10 = vadd.f32 %v125_v9, %v51_v8 }
  0xea   :  { %v127_v11 = vpop.f32.mrf.mxu0 }
  0xeb   :  { %138 = vst.msk [vmem:[#allocation2 + $0x8] sm:$0xff] %vm46_vm1, %v133_v10 }
  0xec   :  { %v129_v13 = vpop.f32.mrf.mxu0 }
  0xed   :  { %v135_v14 = vadd.f32 %v129_v13, %v53_v12 }
  0xef   :  { %140 = vst.msk [vmem:[#allocation2 + $0x18] sm:$0xff] %vm46_vm1, %v135_v14 }
  0xf2   :  { %v145_v15 = vld [vmem:[#allocation2 + $0x8] sm:$0xff] }
  0xf3   :  { %v191_v16 = vpack.c.bf16 %v145_v15, %v123_v7 }
  0xf5   :  { %163 = vst.msk [vmem:[#allocation8] sm:$0xff] %vm162_vm4, %v191_v16 }
  0xf6   :  { %v147_v17 = vld [vmem:[#allocation2 + $0x18] sm:$0xff] }
  0xf7   :  { %v192_v18 = vpack.c.bf16 %v147_v17, %v127_v11 }
  0xf9   :  { %164 = vst.msk [vmem:[#allocation8 + $0x8] sm:$0xff] %vm162_vm4, %v192_v18 }
  0xfa   :  { %260 = shalt.err (!%p257_p0)
}
  0xfb   :  { %176 = dma.vmem_to_hbm [thread:$0]  %s171_s1, 256, %s316_s2, [#allocation5], %s279_s19, %s279_s19, %s280_s20  }
  0xfc   :  { %273 = dma.done.wait [#allocation5], 256  }
  0xfd   :  { %274 = vsyncadd [#allocation5], 4294967040 }
  0xfe   :  { %180 = vsyncpa [#allocation4], 1 }
  0xff   :  { %181 = vsyncpa [#allocation7], 1 }
 0x100   :  { %182 = vsyncpa [#allocation5], 1 }

</bundles_post_ra>
